<compile_context>
chip_gen: v7x
topology: tpu7x:2x2x1
jax: 0.10.0
libtpu: 0.0.40
codegen_flags: <defaults>
</compile_context>

<pallas_src>
import functools

import jax
import jax.numpy as jnp
import numpy as np
from jax import lax
from jax.experimental import pallas as pl
from jax.experimental.pallas import tpu as pltpu


# ----------------------------------------------------------------------------
# Tiling helpers.
# ----------------------------------------------------------------------------
def _batches_per_step(B, N, target_rows=256):
    """Pick how many batch elements to pack per grid step.

    Targets ~target_rows rows (256 fills the v6e/v7x MXU M-dim; 128 already
    suffices on v5e) but keeps >= 2 grid steps when B >= 2 so both v7x
    TensorCores get work.  Must divide B evenly.
    """
    want = max(1, min(B, -(-target_rows // N)))
    if B >= 2:
        want = min(want, max(1, B // 2))
    bg = 1
    for d in range(1, want + 1):
        if B % d == 0:
            bg = d
    return bg


def _row_pack(rows_per_step, out_dim):
    """Pack rows so the stored last dim is a multiple of 128 lanes (dense vst).

    Only applied when it keeps the sublane dim a multiple of 8; otherwise the
    (8,128) block constraint would be violated (e.g. the tiny demo shapes).
    """
    if out_dim % 128 == 0:
        return 1
    if 128 % out_dim == 0:
        p = 128 // out_dim
        if rows_per_step % p == 0 and (rows_per_step // p) % 8 == 0:
            return p
    return 1


# ----------------------------------------------------------------------------
# Fused kernel: qkv projection + per-head attention + output projection.
# ----------------------------------------------------------------------------
def _fused_attn_kernel(x_ref, wqkv_ref, wout_ref, b_ref, o_ref, merged_ref, *,
                       bg, n, heads, dim_head):
    inner = heads * dim_head
    rows = bg * n

    # qkv = x @ W_qkv : one wide MXU matmul, f32 accumulation.
    qkv = jnp.dot(x_ref[...], wqkv_ref[...],
                  preferred_element_type=jnp.float32)            # (rows, 3*inner)

    # Three wide slices, a single bf16 cast each (scale already folded into Wq).
    q = qkv[:, :inner].astype(jnp.bfloat16)
    k = qkv[:, inner:2 * inner].astype(jnp.bfloat16)
    v = qkv[:, 2 * inner:].astype(jnp.bfloat16)

    for h in range(heads):                 # heads is small & static -> unrolled
        lo = h * dim_head
        q_h = q[:, lo:lo + dim_head].reshape(bg, n, dim_head)
        k_h = k[:, lo:lo + dim_head].reshape(bg, n, dim_head)
        v_h = v[:, lo:lo + dim_head].reshape(bg, n, dim_head)

        # dots[b] = q_h[b] @ k_h[b]^T, batched over the bg batch elements.
        dots = lax.dot_general(q_h, k_h, (((2,), (2,)), ((0,), (0,))),
                               preferred_element_type=jnp.float32)  # (bg, n, n)
        m = jnp.max(dots, axis=-1, keepdims=True)
        p = jnp.exp(dots - m)
        attn = p * pl.reciprocal(jnp.sum(p, axis=-1, keepdims=True), approx=True)

        o_h = lax.dot_general(attn.astype(jnp.bfloat16), v_h,
                              (((2,), (1,)), ((0,), (0,))),
                              preferred_element_type=jnp.float32)   # (bg, n, dh)
        # Write head result at its lane offset (replaces the f32 concatenate).
        merged_ref[:, lo:lo + dim_head] = (
            o_h.reshape(rows, dim_head).astype(jnp.bfloat16))

    # Output projection + bias, fused; single (lane-dense when packed) store.
    y = jnp.dot(merged_ref[...], wout_ref[...],
                preferred_element_type=jnp.float32) + b_ref[...]    # (rows, out)
    o_ref[...] = y.reshape(o_ref.shape).astype(o_ref.dtype)


def attention_forward(x, w_qkv, w_out, b_out, *, heads, dim_head):
    """x: (B, N, dim); w_qkv: (dim, 3*inner); w_out: (inner, out_dim); b_out: (out_dim,)."""
    B, N, dim = x.shape
    inner = heads * dim_head
    out_dim = w_out.shape[1]
    scale = float(dim_head) ** -0.5

    # --- one-time parameter transforms (done once at load time in a real model)
    # Fold the softmax scale into the Q columns of W_qkv (exact for power-of-two
    # scales like dim_head=16 -> 0.25), then cast weights to bf16 MXU operands.
    w_qkv_bf = (w_qkv.at[:, :inner].multiply(scale)).astype(jnp.bfloat16)
    w_out_bf = w_out.astype(jnp.bfloat16)
    b2 = b_out.reshape(1, out_dim).astype(jnp.float32)     # bias added in f32

    # --- activation layout: flatten rows, cast to bf16 (halves the x DMA bytes)
    x2 = x.astype(jnp.bfloat16).reshape(B * N, dim)

    bg = _batches_per_step(B, N)
    rows = bg * N
    steps = B // bg
    pack = _row_pack(rows, out_dim)

    out = pl.pallas_call(
        functools.partial(_fused_attn_kernel,
                          bg=bg, n=N, heads=heads, dim_head=dim_head),
        out_shape=jax.ShapeDtypeStruct((B * N // pack, pack * out_dim), x.dtype),
        grid_spec=pltpu.PrefetchScalarGridSpec(
            num_scalar_prefetch=0,
            grid=(steps,),
            in_specs=[
                pl.BlockSpec((rows, dim), lambda b: (b, 0)),        # x row block
                # Grid-invariant weights/bias (constant index_map).
                # TODO(synk): add pipeline_mode=pl.Buffered(1) here if the
                # compiler still double-buffers these (frees VMEM on v7x).
                pl.BlockSpec((dim, 3 * inner), lambda b: (0, 0)),   # W_qkv
                pl.BlockSpec((inner, out_dim), lambda b: (0, 0)),   # W_out
                pl.BlockSpec((1, out_dim), lambda b: (0, 0)),       # bias
            ],
            out_specs=pl.BlockSpec((rows // pack, pack * out_dim),
                                   lambda b: (b, 0)),
            scratch_shapes=[pltpu.VMEM((rows, inner), jnp.bfloat16)],
        ),
        compiler_params=pltpu.CompilerParams(
            dimension_semantics=("parallel",),
            # 32 MiB fits every generation's scoped budget (raises v5e's 16 MiB
            # default, equals the v6e/v7x default, well under v7x's 64 MiB
            # physical).  Re-derive together with KV tiling for long sequences.
            vmem_limit_bytes=32 * 1024 * 1024,
        ),
    )(x2, w_qkv_bf, w_out_bf, b2)

    return out.reshape(B, N, out_dim)


def attention_reference(x, w_qkv, w_out, b_out, *, heads, dim_head):
    """Pure-JAX f32 reference mirroring the PyTorch forward (eval mode)."""
    B, N, dim = x.shape
    scale = float(dim_head) ** -0.5
    qkv = x @ w_qkv
    q, k, v = jnp.split(qkv, 3, axis=-1)

    def split_heads(t):
        return jnp.transpose(t.reshape(B, N, heads, dim_head), (0, 2, 1, 3))

    q, k, v = map(split_heads, (q, k, v))
    dots = jnp.einsum("bhnd,bhmd->bhnm", q, k) * scale
    attn = jax.nn.softmax(dots, axis=-1)
    out = jnp.einsum("bhnm,bhmd->bhnd", attn, v)
    out = jnp.transpose(out, (0, 2, 1, 3)).reshape(B, N, heads * dim_head)
    return out @ w_out + b_out


if __name__ == "__main__":
    # Small, module-consistent shapes:
    #   dim=32, factor=2, heads=4, dim_head=16 -> inner_dim=64, out_dim=64
    #   batch=2 (>=2 keeps both v7x TensorCores busy), seq(n)=8
    B, N, dim = 2, 8, 32
    heads, dim_head, factor = 4, 16, 2
    inner = heads * dim_head
    out_dim = dim * factor

    key = jax.random.PRNGKey(0)
    kx, kqkv, kw, kb = jax.random.split(key, 4)
    x = jax.random.normal(kx, (B, N, dim), dtype=jnp.float32)
    # Deterministic synthetic parameters (no checkpoint loading).
    w_qkv = jax.random.normal(kqkv, (dim, 3 * inner), dtype=jnp.float32) * 0.05
    w_out = jax.random.normal(kw, (inner, out_dim), dtype=jnp.float32) * 0.05
    b_out = jax.random.normal(kb, (out_dim,), dtype=jnp.float32) * 0.05
    # TODO(synk): dropout (p=0.0) is a no-op in eval mode and is omitted.

    y = attention_forward(x, w_qkv, w_out, b_out, heads=heads, dim_head=dim_head)
    y = jax.block_until_ready(y)

    y_ref = attention_reference(x, w_qkv, w_out, b_out, heads=heads, dim_head=dim_head)
    # bf16 MXU operands (f32 accumulation / f32 softmax stats) vs pure-f32 reference.
    np.testing.assert_allclose(np.asarray(y), np.asarray(y_ref), rtol=2e-2, atol=2e-2)

    print("KERNEL_OK")
</pallas_src>

<mosaic_0001>
module attributes {stable_mosaic.version = 11 : i64} {
  func.func @_fused_attn_kernel(%arg0: i32, %arg1: memref<8x32xbf16, #tpu.memory_space<vmem>>, %arg2: memref<32x192xbf16, #tpu.memory_space<vmem>>, %arg3: memref<64x64xbf16, #tpu.memory_space<vmem>>, %arg4: memref<1x64xf32, #tpu.memory_space<vmem>>, %arg5: memref<8x64xf32, #tpu.memory_space<vmem>>, %arg6: memref<8x64xbf16, #tpu.memory_space<vmem>>) attributes {dimension_semantics = [#tpu.dimension_semantics<parallel>], iteration_bounds = array<i64: 2>, scalar_prefetch = 0 : i64, scratch_operands = 1 : i64, tpu.core_type = #tpu.core_type<tc>, window_params = [{transform_indices = @transform_0, window_bounds = array<i64: 8, 32>}, {pipeline_mode = #tpu.pipeline_mode<synchronous>, transform_indices = @transform_1, window_bounds = array<i64: 32, 192>}, {pipeline_mode = #tpu.pipeline_mode<synchronous>, transform_indices = @transform_2, window_bounds = array<i64: 64, 64>}, {pipeline_mode = #tpu.pipeline_mode<synchronous>, transform_indices = @transform_3, window_bounds = array<i64: 1, 64>}, {transform_indices = @transform_4, window_bounds = array<i64: 8, 64>}]} {
    %c0 = arith.constant 0 : index
    %c0_0 = arith.constant 0 : index
    %0 = vector.load %arg1[%c0, %c0_0] : memref<8x32xbf16, #tpu.memory_space<vmem>>, vector<8x32xbf16>
    %c0_1 = arith.constant 0 : index
    %c0_2 = arith.constant 0 : index
    %1 = vector.load %arg2[%c0_1, %c0_2] : memref<32x192xbf16, #tpu.memory_space<vmem>>, vector<32x192xbf16>
    %cst = arith.constant dense<0.000000e+00> : vector<8x192xf32>
    %2 = tpu.matmul %0, %1, %cst {dimension_numbers = #tpu.dot_dimension_numbers<[1], [0], [0], [1], [0, 0, 1, 1], [], []>} : vector<8x32xbf16>, vector<32x192xbf16>, vector<8x192xf32> -> vector<8x192xf32>
    %3 = vector.extract_strided_slice %2 {offsets = [0, 0], sizes = [8, 64], strides = [1, 1]} : vector<8x192xf32> to vector<8x64xf32>
    %4 = arith.truncf %3 : vector<8x64xf32> to vector<8x64xbf16>
    %5 = vector.extract_strided_slice %2 {offsets = [0, 64], sizes = [8, 64], strides = [1, 1]} : vector<8x192xf32> to vector<8x64xf32>
    %6 = arith.truncf %5 : vector<8x64xf32> to vector<8x64xbf16>
    %7 = vector.extract_strided_slice %2 {offsets = [0, 128], sizes = [8, 64], strides = [1, 1]} : vector<8x192xf32> to vector<8x64xf32>
    %8 = arith.truncf %7 : vector<8x64xf32> to vector<8x64xbf16>
    %9 = vector.extract_strided_slice %4 {offsets = [0, 0], sizes = [8, 16], strides = [1, 1]} : vector<8x64xbf16> to vector<8x16xbf16>
    %10 = vector.shape_cast %9 : vector<8x16xbf16> to vector<1x8x16xbf16>
    %11 = vector.extract_strided_slice %6 {offsets = [0, 0], sizes = [8, 16], strides = [1, 1]} : vector<8x64xbf16> to vector<8x16xbf16>
    %12 = vector.shape_cast %11 : vector<8x16xbf16> to vector<1x8x16xbf16>
    %13 = vector.extract_strided_slice %8 {offsets = [0, 0], sizes = [8, 16], strides = [1, 1]} : vector<8x64xbf16> to vector<8x16xbf16>
    %14 = vector.shape_cast %13 : vector<8x16xbf16> to vector<1x8x16xbf16>
    %cst_3 = arith.constant dense<0.000000e+00> : vector<1x8x8xf32>
    %15 = tpu.matmul %10, %12, %cst_3 {dimension_numbers = #tpu.dot_dimension_numbers<[2], [2], [1], [1], [0, 0, 0, 1, 1, 1], [0], [0]>} : vector<1x8x16xbf16>, vector<1x8x16xbf16>, vector<1x8x8xf32> -> vector<1x8x8xf32>
    %cst_4 = arith.constant dense<0xFF800000> : vector<1x8xf32>
    %16 = vector.multi_reduction <maximumf>, %15, %cst_4 [2] : vector<1x8x8xf32> to vector<1x8xf32>
    %17 = vector.shape_cast %16 : vector<1x8xf32> to vector<1x8x1xf32>
    %18 = vector.broadcast %17 : vector<1x8x1xf32> to vector<1x8x8xf32>
    %19 = arith.subf %15, %18 : vector<1x8x8xf32>
    %20 = math.exp %19 : vector<1x8x8xf32>
    %cst_5 = arith.constant dense<0.000000e+00> : vector<1x8xf32>
    %21 = vector.multi_reduction <add>, %20, %cst_5 [2] : vector<1x8x8xf32> to vector<1x8xf32>
    %22 = vector.shape_cast %21 : vector<1x8xf32> to vector<1x8x1xf32>
    %23 = tpu.reciprocal %22 {approx = true} : vector<1x8x1xf32> -> vector<1x8x1xf32>
    %24 = vector.broadcast %23 : vector<1x8x1xf32> to vector<1x8x8xf32>
    %25 = arith.mulf %20, %24 : vector<1x8x8xf32>
    %26 = arith.truncf %25 : vector<1x8x8xf32> to vector<1x8x8xbf16>
    %cst_6 = arith.constant dense<0.000000e+00> : vector<1x8x16xf32>
    %27 = tpu.matmul %26, %14, %cst_6 {dimension_numbers = #tpu.dot_dimension_numbers<[2], [1], [1], [2], [0, 0, 0, 1, 1, 2], [0], [0]>} : vector<1x8x8xbf16>, vector<1x8x16xbf16>, vector<1x8x16xf32> -> vector<1x8x16xf32>
    %28 = vector.shape_cast %27 : vector<1x8x16xf32> to vector<8x16xf32>
    %29 = arith.truncf %28 : vector<8x16xf32> to vector<8x16xbf16>
    %c0_7 = arith.constant 0 : index
    %c0_8 = arith.constant 0 : index
    %30 = vector.load %arg6[%c0_7, %c0_8] : memref<8x64xbf16, #tpu.memory_space<vmem>>, vector<8x16xbf16>
    tpu.vector_store %arg6[%c0_7, %c0_8], %29 {strides = array<i32>} : memref<8x64xbf16, #tpu.memory_space<vmem>>, vector<8x16xbf16>,
    %31 = vector.extract_strided_slice %4 {offsets = [0, 16], sizes = [8, 16], strides = [1, 1]} : vector<8x64xbf16> to vector<8x16xbf16>
    %32 = vector.shape_cast %31 : vector<8x16xbf16> to vector<1x8x16xbf16>
    %33 = vector.extract_strided_slice %6 {offsets = [0, 16], sizes = [8, 16], strides = [1, 1]} : vector<8x64xbf16> to vector<8x16xbf16>
    %34 = vector.shape_cast %33 : vector<8x16xbf16> to vector<1x8x16xbf16>
    %35 = vector.extract_strided_slice %8 {offsets = [0, 16], sizes = [8, 16], strides = [1, 1]} : vector<8x64xbf16> to vector<8x16xbf16>
    %36 = vector.shape_cast %35 : vector<8x16xbf16> to vector<1x8x16xbf16>
    %cst_9 = arith.constant dense<0.000000e+00> : vector<1x8x8xf32>
    %37 = tpu.matmul %32, %34, %cst_9 {dimension_numbers = #tpu.dot_dimension_numbers<[2], [2], [1], [1], [0, 0, 0, 1, 1, 1], [0], [0]>} : vector<1x8x16xbf16>, vector<1x8x16xbf16>, vector<1x8x8xf32> -> vector<1x8x8xf32>
    %cst_10 = arith.constant dense<0xFF800000> : vector<1x8xf32>
    %38 = vector.multi_reduction <maximumf>, %37, %cst_10 [2] : vector<1x8x8xf32> to vector<1x8xf32>
    %39 = vector.shape_cast %38 : vector<1x8xf32> to vector<1x8x1xf32>
    %40 = vector.broadcast %39 : vector<1x8x1xf32> to vector<1x8x8xf32>
    %41 = arith.subf %37, %40 : vector<1x8x8xf32>
    %42 = math.exp %41 : vector<1x8x8xf32>
    %cst_11 = arith.constant dense<0.000000e+00> : vector<1x8xf32>
    %43 = vector.multi_reduction <add>, %42, %cst_11 [2] : vector<1x8x8xf32> to vector<1x8xf32>
    %44 = vector.shape_cast %43 : vector<1x8xf32> to vector<1x8x1xf32>
    %45 = tpu.reciprocal %44 {approx = true} : vector<1x8x1xf32> -> vector<1x8x1xf32>
    %46 = vector.broadcast %45 : vector<1x8x1xf32> to vector<1x8x8xf32>
    %47 = arith.mulf %42, %46 : vector<1x8x8xf32>
    %48 = arith.truncf %47 : vector<1x8x8xf32> to vector<1x8x8xbf16>
    %cst_12 = arith.constant dense<0.000000e+00> : vector<1x8x16xf32>
    %49 = tpu.matmul %48, %36, %cst_12 {dimension_numbers = #tpu.dot_dimension_numbers<[2], [1], [1], [2], [0, 0, 0, 1, 1, 2], [0], [0]>} : vector<1x8x8xbf16>, vector<1x8x16xbf16>, vector<1x8x16xf32> -> vector<1x8x16xf32>
    %50 = vector.shape_cast %49 : vector<1x8x16xf32> to vector<8x16xf32>
    %51 = arith.truncf %50 : vector<8x16xf32> to vector<8x16xbf16>
    %c0_13 = arith.constant 0 : index
    %c16 = arith.constant 16 : index
    %52 = vector.load %arg6[%c0_13, %c16] : memref<8x64xbf16, #tpu.memory_space<vmem>>, vector<8x16xbf16>
    tpu.vector_store %arg6[%c0_13, %c16], %51 {strides = array<i32>} : memref<8x64xbf16, #tpu.memory_space<vmem>>, vector<8x16xbf16>,
    %53 = vector.extract_strided_slice %4 {offsets = [0, 32], sizes = [8, 16], strides = [1, 1]} : vector<8x64xbf16> to vector<8x16xbf16>
    %54 = vector.shape_cast %53 : vector<8x16xbf16> to vector<1x8x16xbf16>
    %55 = vector.extract_strided_slice %6 {offsets = [0, 32], sizes = [8, 16], strides = [1, 1]} : vector<8x64xbf16> to vector<8x16xbf16>
    %56 = vector.shape_cast %55 : vector<8x16xbf16> to vector<1x8x16xbf16>
    %57 = vector.extract_strided_slice %8 {offsets = [0, 32], sizes = [8, 16], strides = [1, 1]} : vector<8x64xbf16> to vector<8x16xbf16>
    %58 = vector.shape_cast %57 : vector<8x16xbf16> to vector<1x8x16xbf16>
    %cst_14 = arith.constant dense<0.000000e+00> : vector<1x8x8xf32>
    %59 = tpu.matmul %54, %56, %cst_14 {dimension_numbers = #tpu.dot_dimension_numbers<[2], [2], [1], [1], [0, 0, 0, 1, 1, 1], [0], [0]>} : vector<1x8x16xbf16>, vector<1x8x16xbf16>, vector<1x8x8xf32> -> vector<1x8x8xf32>
    %cst_15 = arith.constant dense<0xFF800000> : vector<1x8xf32>
    %60 = vector.multi_reduction <maximumf>, %59, %cst_15 [2] : vector<1x8x8xf32> to vector<1x8xf32>
    %61 = vector.shape_cast %60 : vector<1x8xf32> to vector<1x8x1xf32>
    %62 = vector.broadcast %61 : vector<1x8x1xf32> to vector<1x8x8xf32>
    %63 = arith.subf %59, %62 : vector<1x8x8xf32>
    %64 = math.exp %63 : vector<1x8x8xf32>
    %cst_16 = arith.constant dense<0.000000e+00> : vector<1x8xf32>
    %65 = vector.multi_reduction <add>, %64, %cst_16 [2] : vector<1x8x8xf32> to vector<1x8xf32>
    %66 = vector.shape_cast %65 : vector<1x8xf32> to vector<1x8x1xf32>
    %67 = tpu.reciprocal %66 {approx = true} : vector<1x8x1xf32> -> vector<1x8x1xf32>
    %68 = vector.broadcast %67 : vector<1x8x1xf32> to vector<1x8x8xf32>
    %69 = arith.mulf %64, %68 : vector<1x8x8xf32>
    %70 = arith.truncf %69 : vector<1x8x8xf32> to vector<1x8x8xbf16>
    %cst_17 = arith.constant dense<0.000000e+00> : vector<1x8x16xf32>
    %71 = tpu.matmul %70, %58, %cst_17 {dimension_numbers = #tpu.dot_dimension_numbers<[2], [1], [1], [2], [0, 0, 0, 1, 1, 2], [0], [0]>} : vector<1x8x8xbf16>, vector<1x8x16xbf16>, vector<1x8x16xf32> -> vector<1x8x16xf32>
    %72 = vector.shape_cast %71 : vector<1x8x16xf32> to vector<8x16xf32>
    %73 = arith.truncf %72 : vector<8x16xf32> to vector<8x16xbf16>
    %c0_18 = arith.constant 0 : index
    %c32 = arith.constant 32 : index
    %74 = vector.load %arg6[%c0_18, %c32] : memref<8x64xbf16, #tpu.memory_space<vmem>>, vector<8x16xbf16>
    tpu.vector_store %arg6[%c0_18, %c32], %73 {strides = array<i32>} : memref<8x64xbf16, #tpu.memory_space<vmem>>, vector<8x16xbf16>,
    %75 = vector.extract_strided_slice %4 {offsets = [0, 48], sizes = [8, 16], strides = [1, 1]} : vector<8x64xbf16> to vector<8x16xbf16>
    %76 = vector.shape_cast %75 : vector<8x16xbf16> to vector<1x8x16xbf16>
    %77 = vector.extract_strided_slice %6 {offsets = [0, 48], sizes = [8, 16], strides = [1, 1]} : vector<8x64xbf16> to vector<8x16xbf16>
    %78 = vector.shape_cast %77 : vector<8x16xbf16> to vector<1x8x16xbf16>
    %79 = vector.extract_strided_slice %8 {offsets = [0, 48], sizes = [8, 16], strides = [1, 1]} : vector<8x64xbf16> to vector<8x16xbf16>
    %80 = vector.shape_cast %79 : vector<8x16xbf16> to vector<1x8x16xbf16>
    %cst_19 = arith.constant dense<0.000000e+00> : vector<1x8x8xf32>
    %81 = tpu.matmul %76, %78, %cst_19 {dimension_numbers = #tpu.dot_dimension_numbers<[2], [2], [1], [1], [0, 0, 0, 1, 1, 1], [0], [0]>} : vector<1x8x16xbf16>, vector<1x8x16xbf16>, vector<1x8x8xf32> -> vector<1x8x8xf32>
    %cst_20 = arith.constant dense<0xFF800000> : vector<1x8xf32>
    %82 = vector.multi_reduction <maximumf>, %81, %cst_20 [2] : vector<1x8x8xf32> to vector<1x8xf32>
    %83 = vector.shape_cast %82 : vector<1x8xf32> to vector<1x8x1xf32>
    %84 = vector.broadcast %83 : vector<1x8x1xf32> to vector<1x8x8xf32>
    %85 = arith.subf %81, %84 : vector<1x8x8xf32>
    %86 = math.exp %85 : vector<1x8x8xf32>
    %cst_21 = arith.constant dense<0.000000e+00> : vector<1x8xf32>
    %87 = vector.multi_reduction <add>, %86, %cst_21 [2] : vector<1x8x8xf32> to vector<1x8xf32>
    %88 = vector.shape_cast %87 : vector<1x8xf32> to vector<1x8x1xf32>
    %89 = tpu.reciprocal %88 {approx = true} : vector<1x8x1xf32> -> vector<1x8x1xf32>
    %90 = vector.broadcast %89 : vector<1x8x1xf32> to vector<1x8x8xf32>
    %91 = arith.mulf %86, %90 : vector<1x8x8xf32>
    %92 = arith.truncf %91 : vector<1x8x8xf32> to vector<1x8x8xbf16>
    %cst_22 = arith.constant dense<0.000000e+00> : vector<1x8x16xf32>
    %93 = tpu.matmul %92, %80, %cst_22 {dimension_numbers = #tpu.dot_dimension_numbers<[2], [1], [1], [2], [0, 0, 0, 1, 1, 2], [0], [0]>} : vector<1x8x8xbf16>, vector<1x8x16xbf16>, vector<1x8x16xf32> -> vector<1x8x16xf32>
    %94 = vector.shape_cast %93 : vector<1x8x16xf32> to vector<8x16xf32>
    %95 = arith.truncf %94 : vector<8x16xf32> to vector<8x16xbf16>
    %c0_23 = arith.constant 0 : index
    %c48 = arith.constant 48 : index
    %96 = vector.load %arg6[%c0_23, %c48] : memref<8x64xbf16, #tpu.memory_space<vmem>>, vector<8x16xbf16>
    tpu.vector_store %arg6[%c0_23, %c48], %95 {strides = array<i32>} : memref<8x64xbf16, #tpu.memory_space<vmem>>, vector<8x16xbf16>,
    %c0_24 = arith.constant 0 : index
    %c0_25 = arith.constant 0 : index
    %97 = vector.load %arg6[%c0_24, %c0_25] : memref<8x64xbf16, #tpu.memory_space<vmem>>, vector<8x64xbf16>
    %c0_26 = arith.constant 0 : index
    %c0_27 = arith.constant 0 : index
    %98 = vector.load %arg3[%c0_26, %c0_27] : memref<64x64xbf16, #tpu.memory_space<vmem>>, vector<64x64xbf16>
    %cst_28 = arith.constant dense<0.000000e+00> : vector<8x64xf32>
    %99 = tpu.matmul %97, %98, %cst_28 {dimension_numbers = #tpu.dot_dimension_numbers<[1], [0], [0], [1], [0, 0, 1, 1], [], []>} : vector<8x64xbf16>, vector<64x64xbf16>, vector<8x64xf32> -> vector<8x64xf32>
    %c0_29 = arith.constant 0 : index
    %c0_30 = arith.constant 0 : index
    %100 = vector.load %arg4[%c0_29, %c0_30] : memref<1x64xf32, #tpu.memory_space<vmem>>, vector<1x64xf32>
    %101 = vector.broadcast %100 : vector<1x64xf32> to vector<8x64xf32>
    %102 = arith.addf %99, %101 : vector<8x64xf32>
    %c0_31 = arith.constant 0 : index
    %c0_32 = arith.constant 0 : index
    %103 = vector.load %arg5[%c0_31, %c0_32] : memref<8x64xf32, #tpu.memory_space<vmem>>, vector<8x64xf32>
    tpu.vector_store %arg5[%c0_31, %c0_32], %102 {strides = array<i32>} : memref<8x64xf32, #tpu.memory_space<vmem>>, vector<8x64xf32>,
    return
  }
  func.func @transform_0(%arg0: i32) -> (i32, i32) {
    %c0_i32 = arith.constant 0 : i32
    %c0_i32_0 = arith.constant 0 : i32
    return %arg0, %c0_i32 : i32, i32
  }
  func.func @transform_1(%arg0: i32) -> (i32, i32) {
    %c0_i32 = arith.constant 0 : i32
    %c0_i32_0 = arith.constant 0 : i32
    %c0_i32_1 = arith.constant 0 : i32
    return %c0_i32, %c0_i32_0 : i32, i32
  }
  func.func @transform_2(%arg0: i32) -> (i32, i32) {
    %c0_i32 = arith.constant 0 : i32
    %c0_i32_0 = arith.constant 0 : i32
    %c0_i32_1 = arith.constant 0 : i32
    return %c0_i32, %c0_i32_0 : i32, i32
  }
  func.func @transform_3(%arg0: i32) -> (i32, i32) {
    %c0_i32 = arith.constant 0 : i32
    %c0_i32_0 = arith.constant 0 : i32
    %c0_i32_1 = arith.constant 0 : i32
    return %c0_i32, %c0_i32_0 : i32, i32
  }
  func.func @transform_4(%arg0: i32) -> (i32, i32) {
    %c0_i32 = arith.constant 0 : i32
    %c0_i32_0 = arith.constant 0 : i32
    return %arg0, %c0_i32 : i32, i32
  }
}

</mosaic_0001>

<bundles_post_ra>
// kernel: tpu_custom_call.1
= control target key start
LH: loop header
LB: loop body
LE: loop exit
PB: predicated region body
PF: predicated region fallthrough
CT: control target
= control target key end

     0   :  { %9 = vsyncpa [#allocation4], 0  ;;  %s1709_s0 = inlined_call_operand.hbm [shape: bf16[16,32], index: 0, kind: input, shape index: {}]   ;;  %s1710_s1 = inlined_call_operand.hbm [shape: bf16[32,192], index: 1, kind: input, shape index: {}]   ;;  %s1711_s2 = inlined_call_operand.hbm [shape: bf16[64,64], index: 2, kind: input, shape index: {}]   ;;  %s1712_s3 = inlined_call_operand.vmem [shape: f32[1,64], index: 3, kind: input, shape index: {}]   ;;  %s1713_s4 = inlined_call_operand.hbm [shape: f32[16,64], index: 4, kind: output, shape index: {}]  }
   0x1   :  { %11 = vsyncpa [#allocation4 + $0x1], 0 }
   0x2   :  { %12 = vsyncpa [#allocation7], 0 }
   0x3   :  { %13 = vsyncpa [#allocation5], 0 }
   0x4   :  { %15 = vsyncpa [#allocation5 + $0x1], 0  ;;  %s1404_s15 = smov 0   ;;  %s1406_s16 = smov 0  }
   0x5   :  { %s1408_s17 = smov 0   ;;  %s1410_s18 = smov 0  }
   0x6 LB: > { %s1425_s19 = sadd.s32 4294967295, %s1359_s18   ;;  %s974_s20 = sadd.s32 4294967294, %s1359_s18   ;;  %s1359_s18 = sphi %s1410_s18, %s1733_s18   ;;  %s1355_s17 = sphi %s1408_s17, %s1732_s17   ;;  %s1351_s16 = sphi %s1406_s16, %s1731_s16   ;;  %s1347_s15 = sphi %s1404_s15, %s1730_s15  }
   0x7   : > { %p41_p0 = scmp.ne.s32.totalorder %s1351_s16, %s1347_s15  ;;  %p1714_p1 = scmp.eq.s32.totalorder %s1425_s19, 0 }
   0x8   : > { %p134_p3 = scmp.eq.s32.totalorder %s974_s20, 1  ;;  %p975_p5 = scmp.ge.s32.totalorder %s1359_s18, 1 }
   0x9   : > { %p1434_p4 = por %p1714_p1, %p41_p0  ;;  %p141_p7 = scmp.lt.s32.totalorder %s1359_s18, 3 }
   0xa   : > { %p1439_p6 = por %p134_p3, %p41_p0  ;;  %s1361_s24 = smov [#allocation6]  }
   0xb   : > { %s1717_s21 = scalar_select %p1434_p4, 1, 0 }
   0xc   : > { %s1718_s22 = scalar_select %p1439_p6, 1, 0 }
   0xd   : > { %p1444_p8 = pnand %p975_p5, %p141_p7  ;;  %s153_s25 = sshll.u32 %s1361_s24, 4  ;;  %s1448_s25 = int_to_ptr.vmem [resolvable:$true] %s153_s25 }
   0xe   : > { %s1362_s27 = smov [#allocation8]   ;;  %s1203_s5 = scalar_lea.hbm %s1710_s1, 512 }
   0xf   : > { %p1108_p9 = pneg %p1444_p8  ;;  %s166_s28 = sshll.u32 %s1362_s27, 4  ;;  %s1459_s28 = int_to_ptr.vmem [resolvable:$true] %s166_s28 }
  0x10   : > { %p1204_p12 = scmp.ne.s32.totalorder %s1710_s1, %s1203_s5  ;;  %p1210_p5 = scmp.lt.u32.totalorder %s1203_s5, %s1710_s1 }
  0x11   : > { %p1455_p11 = pnand %p1108_p9, %p1714_p1 }
  0x13   : > { %p1205_p13 = pneg %p1455_p11 }
  0x15   : > { %p1206_p0 = pnand %p1205_p13, %p1204_p12 }
  0x17   : > { %p1207_p3 = pneg %p1206_p0 }
  0x19   : > { %p1212_p7 = pnand %p1210_p5, %p1207_p3 }
  0x1b   : > { %1215 = shalt.err (!%p1212_p7)
}
  0x1c   : > { %s1216_s10 = scalar_lea.vmem %s1448_s25, 512  ;;  %p1224_p2 = scmp.lt.s32.totalorder %s1448_s25, %s1448_s25 }
  0x1d   : > { %p1217_p9 = scmp.ne.s32.totalorder %s1448_s25, %s1216_s10  ;;  %p1225_p12 = scmp.lt.s32.totalorder %s1216_s10, %s1216_s10 }
  0x1f   : > { %p1219_p10 = pnand %p1217_p9, %p1205_p13  ;;  %p1226_p0 = por %p1225_p12, %p1224_p2 }
  0x21   : > { %p1220_p1 = pneg %p1219_p10 }
  0x23   : > { %p1227_p6 = pnand %p1226_p0, %p1220_p1 }
  0x25   : > { %1230 = shalt.err (!%p1227_p6)
}
  0x26   : > { %s1363_s11 = smov 128   ;;  %s1364_s12 = smov 8  }
  0x27   : > { %1111 = dma.hbm_to_vmem [thread:$0]  (!%p1455_p11), %s1710_s1, 512, %s1448_s25, [#allocation7], %s1363_s11, %s1363_s11, %s1364_s12  }
  0x28   : > { %s1231_s27 = scalar_lea.hbm %s1711_s2, 512 }
  0x29   : > { %p1232_p2 = scmp.ne.s32.totalorder %s1711_s2, %s1231_s27  ;;  %p1238_p10 = scmp.lt.u32.totalorder %s1231_s27, %s1711_s2 }
  0x2b   : > { %p1234_p1 = pnand %p1232_p2, %p1205_p13 }
  0x2d   : > { %p1235_p6 = pneg %p1234_p1 }
  0x2f   : > { %p1240_p3 = pnand %p1238_p10, %p1235_p6 }
  0x31   : > { %1243 = shalt.err (!%p1240_p3)
}
  0x32   : > { %s1244_s25 = scalar_lea.vmem %s1459_s28, 512  ;;  %p1252_p12 = scmp.lt.s32.totalorder %s1459_s28, %s1459_s28 }
  0x33   : > { %p1245_p5 = scmp.ne.s32.totalorder %s1459_s28, %s1244_s25  ;;  %p1253_p0 = scmp.lt.s32.totalorder %s1244_s25, %s1244_s25 }
  0x35   : > { %p1247_p7 = pnand %p1245_p5, %p1205_p13  ;;  %p1254_p2 = por %p1253_p0, %p1252_p12 }
  0x37   : > { %p1248_p9 = pneg %p1247_p7 }
  0x39   : > { %p1255_p1 = pnand %p1254_p2, %p1248_p9 }
  0x3b   : > { %1258 = shalt.err (!%p1255_p1)
}
  0x3c   : > { %s1365_s7 = smov 64   ;;  %s1366_s8 = smov 4  }
  0x3d   : > { %1114 = dma.hbm_to_vmem [thread:$0]  (!%p1455_p11), %s1711_s2, 512, %s1459_s28, [#allocation7], %s1365_s7, %s1365_s7, %s1366_s8  }
  0x3e   : > { %s1514_s11 = sadd.s32 1, %s1359_s18   ;;  %s28_s13 = sadd.s32 1, %s1355_s17 }
  0x3f   : > { %s25_s12 = ssub.s32 %s1359_s18, %s1514_s11  ;;  %p35_p6 = scmp.ne.s32.totalorder %s1355_s17, %s1351_s16 }
  0x40   : > { %p26_p13 = scmp.eq.s32.totalorder %s25_s12, 0  ;;  %p36_p10 = scmp.eq.s32.totalorder %s1359_s18, 0 }
  0x41   : > { %p1721_p5 = scmp.eq.s32.totalorder %s1425_s19, 1  ;;  %p1125_p9 = scmp.lt.s32.totalorder %s1359_s18, 2 }
  0x42   : > { %s1523_s14 = scalar_select %p26_p13, %s1355_s17, %s28_s13  }
  0x43   : > { %p37_p3 = por %p36_p10, %p35_p6  ;;  %p1527_p7 = por %p1721_p5, %p35_p6 }
  0x44   : > { %s183_s26 = sand.u32 1, %s1355_s17   ;;  %s980_s28 = sshll.u32 %s1359_s18, 6 }
  0x45   : > { %s1722_s20 = scalar_select %p1527_p7, 1, 0 }
  0x46   : > { %s979_s24 = sshll.u32 %s183_s26, 2  ;;  %s1537_s30 = scalar_lea.hbm %s1709_s0, %s980_s28 }
  0x47   : > { %s187_s5 = scalar_lea.vmem [#allocation3], %s979_s24  ;;  %p1541_p11 = pnand %p1125_p9, %p37_p3 }
  0x48   : > { %s194_s6 = sshll.u32 %s187_s5, 4  ;;  %s184_s7 = scalar_lea.sflag [#allocation4], %s183_s26  ;;  %s1539_s6 = int_to_ptr.vmem [resolvable:$true] %s194_s6 }
  0x49   : > { %s1259_s8 = scalar_lea.hbm %s1537_s30, 64  ;;  %p1261_p0 = pneg %p1541_p11 }
  0x4a   : > { %p1260_p12 = scmp.ne.s32.totalorder %s1537_s30, %s1259_s8  ;;  %s1264_s12 = scalar_lea.hbm %s1709_s0, 128 }
  0x4b   : > { %p1265_p13 = scmp.lt.u32.totalorder %s1537_s30, %s1709_s0  ;;  %p1266_p6 = scmp.lt.u32.totalorder %s1264_s12, %s1259_s8 }
  0x4c   : > { %p1262_p2 = pnand %p1261_p0, %p1260_p12  ;;  %p1268_p3 = scmp.lt.u32.totalorder %s1259_s8, %s1537_s30 }
  0x4d   : > { %p1267_p10 = por %p1266_p6, %p1265_p13 }
  0x4e   : > { %p1263_p1 = pneg %p1262_p2 }
  0x4f   : > { %p1269_p5 = por %p1268_p3, %p1267_p10 }
  0x51   : > { %p1270_p9 = pnand %p1269_p5, %p1263_p1 }
  0x53   : > { %1273 = shalt.err (!%p1270_p9)
}
  0x54   : > { %s1274_s26 = scalar_lea.vmem %s1539_s6, 64  ;;  %s1367_s28 = smov [#allocation3]  }
  0x55   : > { %p1275_p12 = scmp.ne.s32.totalorder %s1539_s6, %s1274_s26  ;;  %s1279_s27 = sshll.u32 %s1367_s28, 4  ;;  %s1280_s27 = int_to_ptr.vmem [resolvable:$false] %s1279_s27 }
  0x56   : > { %s1281_s29 = scalar_lea.vmem %s1280_s27, 128  ;;  %p1282_p4 = scmp.lt.s32.totalorder %s1539_s6, %s1280_s27 }
  0x57   : > { %p1277_p2 = pnand %p1275_p12, %p1261_p0  ;;  %p1283_p13 = scmp.lt.s32.totalorder %s1281_s29, %s1274_s26 }
  0x59   : > { %p1278_p7 = pneg %p1277_p2  ;;  %p1284_p6 = por %p1283_p13, %p1282_p4 }
  0x5b   : > { %p1285_p10 = pnand %p1284_p6, %p1278_p7 }
  0x5d   : > { %1288 = shalt.err (!%p1285_p10)
}
  0x5e   : > { %1118 = dma.hbm_to_vmem [thread:$0]  (!%p1541_p11), %s1537_s30, 64, %s1539_s6, %s184_s7  }
  0x5f   : > { %203 = sbr.rel (%p1444_p8) target bundleno = 1606 (0x646), region = 36  ;;  %s1573_s5 = sand.u32 (!%p1444_p8), 1, %s1351_s16  }
  0x60   : > { %s982_s8 = sshll.u32 (!%p1444_p8), %s1573_s5, 2  ;;  %s206_s9 = scalar_lea.sflag (!%p1444_p8), [#allocation4], %s1573_s5 }
  0x61   : > { %s209_s10 = scalar_lea.vmem (!%p1444_p8), [#allocation3], %s982_s8  ;;  %p1724_p4 = scmp.ne.s32.totalorder (!%p1444_p8), %s1717_s21, 0 }
  0x66   : > { %1334 = dma.done.wait (%p1724_p4), %s206_s9, 64  }
  0x67   : > { %1336 = vsyncadd (%p1724_p4), %s206_s9, 4294967232  ;;  %p1725_p7 = scmp.eq.s32.totalorder %s1425_s19, 0 }
  0x69   : > { %1338 = dma.done.wait (%p1725_p7), [#allocation7], 1024   ;;  %p1726_p11 = pmov %p1725_p7 }
  0x6a   : > { %v1368_v0 = vmov 0   ;;  %v1177_v1 = vld [vmem:[#allocation6 + $0x4] ss:$8 sps:$4 sm:$0xff]   ;;  %v1179_v2 = vld [vmem:[#allocation6] ss:$8 sps:$4 sm:$0xff]   ;;  %vm268_vm0 = vcmask 261120  }
  0x6b   : > { %1340 = vsyncadd (%p1726_p11), [#allocation7], 4294966272  ;;  %304 = vmatprep.mubr.bf16.mxu0 %v1368_v0  ;;  %272 = vmatprep.subr.bf16.mxu0 %v1177_v1  ;;  %v1180_v3 = vld [vmem:[#allocation6 + $0x14] ss:$8 sps:$4 sm:$0xff]   ;;  %v1182_v4 = vld [vmem:[#allocation6 + $0x10] ss:$8 sps:$4 sm:$0xff]  }
  0x6c   : > { %273 = vmatpush1.bf16.msra.mxu0 %v1179_v2  ;;  %v243_v5 = vld [vmem:[%s209_s10] sm:$0xf]  ;;  %v1369_v6 = vmov 0.0   ;;  %vm1370_vm1 = vmmov 0   ;;  %vm381_vm2 = vcmask 1043456   ;;  %s1371_s21 = smov 112  }
  0x6d   : > { %274 = vmatprep.subr.bf16.mxu0 %v1180_v3  ;;  %1036 = vmatprep.subr.bf16.mxu1 %v1369_v6  ;;  %s1372_s23 = smov 64   ;;  %s1373_s30 = smov 32   ;;  %vm318_vm3 = vcmask 130048   ;;  %vm365_vm4 = vcmask 64512   ;;  %vm426_vm5 = vcmask 125952   ;;  %vm546_vm6 = vcmask 257152  }
  0x6e   : > { %1038 = vmatprep.mubr.msk.bf16.mxu1 %vm1370_vm1, %v1369_v6  ;;  %s1374_s6 = smov 48   ;;  %s1375_s25 = smov 16   ;;  %vm665_vm7 = vcmask 388352   ;;  %vm784_vm8 = vcmask 519552   ;;  %vm826_vm9 = vcmask 523264  }
  0x6f   : > { %s1376_s7 = smov 96   ;;  %s1377_s12 = smov 80  }
  0x70   : > { %275 = vmatpush1.bf16.msra.mxu0 %v1182_v4  ;;  %s985_s13 = sshll.u32 %s1573_s5, 3  ;;  %s1009_s28 = sshll.u32 %s1425_s19, 7 }
  0x71   : > { %1042 = vmatprep.subr.bf16.mxu0 %v1369_v6  ;;  %s241_s27 = scalar_lea.vmem [#allocation9], %s985_s13  ;;  %s1665_s10 = scalar_lea.hbm %s1713_s4, %s1009_s28 }
  0x72   : > { %s885_s29 = sshll.u32 %s241_s27, 4  ;;  %p1727_p0 = scmp.ne.s32.totalorder %s1722_s20, 0  ;;  %s1667_s29 = int_to_ptr.vmem [resolvable:$true] %s885_s29 }
  0x73   : > { %990 = vmatmul.mubr.msk.bf16.vlgmr.msra.gmra.mrb[0].mxu0 %vm268_vm0, %v243_v5  ;;  %s1289_s19 = scalar_lea.vmem %s1667_s29, 128 }
  0x74   : > { %1044 = vmatprep.mubr.msk.bf16.mxu0 %vm1370_vm1, %v1369_v6  ;;  %p1290_p8 = scmp.ne.s32.totalorder %s1667_s29, %s1289_s19 }
  0x76   : > { %p1291_p1 = pnand %p1290_p8, %p1727_p0 }
  0x78   : > { %p1292_p3 = pneg %p1291_p1 }
 0x146   : > { %v306_v7 = vpop.f32.mrb[0].mxu0 }
 0x147   : > { %v313_v8 = vpack.c.bf16 %v306_v7, %v306_v7  ;;  %v308_v9 = vpop.f32.mrb[1].mxu0 }
 0x148   : > { %v1591_v10 = vpack.c.bf16 %v308_v9, %v308_v9  ;;  %v310_v11 = vpop.f32.mrb[2].mxu0 }
 0x149   : > { %428 = vrot.lane.b32.xlu1 %v313_v8, %s1371_s21  ;;  %316 = vrot.lane.b32.xlu0 %v313_v8, %s1372_s23  ;;  %v311_v12 = vpop.f32.mrb[3].mxu0  ;;  %s1378_s23 = smov [#allocation9]  }
 0x14a   : > { %v383_v13 = vsel %vm381_vm2, %v1591_v10, 0 }
 0x14b   : > { %1043 = vmatpush3.bf16.msra.mxu0 %v383_v13 }
 0x14c   : > { %1054 = vmatprep.subr.bf16.mxu0 %v1369_v6 }
 0x14d   : > { %550 = vrot.lane.b32.xlu1 %v313_v8, %s1373_s30  ;;  %430 = vrot.lane.b32.xlu0 %v313_v8, %s1374_s6 }
 0x151   : > { %669 = vrot.lane.b32.xlu1 %v313_v8, %s1375_s25  ;;  %548 = vrot.lane.b32.xlu0 %v313_v8, %s1376_s7 }
 0x155   : > { %667 = vrot.lane.b32.xlu0 %v313_v8, %s1377_s12 }
 0x1bb   : > { %v317_v14 = vpop.permute.xlu0 %316  ;;  %v429_v17 = vpop.permute.xlu1 %428 }
 0x1bc   : > { %v323_v15 = vsel %vm318_vm3, %v317_v14, 0 }
 0x1bd   : > { %1037 = vmatpush3.bf16.xpose.msra.mxu1 %v323_v15 }
 0x1be   : > { %1048 = vmatprep.subr.bf16.mxu1 %v1369_v6 }
 0x1bf   : > { %v431_v16 = vpop.permute.xlu0 %430  ;;  %v551_v19 = vpop.permute.xlu1 %550 }
 0x1c0   : > { %v436_v18 = vsel %vm318_vm3, %v431_v16, 0  ;;  %v556_v20 = vsel %vm318_vm3, %v551_v19, 0 }
 0x1c3   : > { %v670_v21 = vpop.permute.xlu1 %669  ;;  %v549_v22 = vpop.permute.xlu0 %548 }
 0x1c4   : > { %1039 = vmatmul.mubr.msk.bf16.vlgmr.msra.gmra.mrb[0].mxu1 %vm318_vm3, %v313_v8  ;;  %v675_v23 = vsel %vm318_vm3, %v670_v21, 0 }
 0x1c5   : > { %1049 = vmatpush3.bf16.xpose.msra.mxu1 %v436_v18  ;;  %1050 = vmatprep.mubr.msk.bf16.mxu1 %vm1370_vm1, %v1369_v6 }
 0x1c6   : > { %1060 = vmatprep.subr.bf16.mxu1 %v1369_v6 }
 0x1c7   : > { %v668_v24 = vpop.permute.xlu0 %667 }
 0x1cc   : > { %1051 = vmatmul.mubr.msk.bf16.vlgmr.msra.gmra.mrb[4].mxu1 %vm318_vm3, %v429_v17 }
 0x1cd   : > { %1061 = vmatpush3.bf16.xpose.msra.mxu1 %v556_v20  ;;  %1062 = vmatprep.mubr.msk.bf16.mxu1 %vm1370_vm1, %v1369_v6 }
 0x1ce   : > { %1072 = vmatprep.subr.bf16.mxu1 %v1369_v6 }
 0x1d4   : > { %1063 = vmatmul.mubr.msk.bf16.vlgmr.msra.gmra.mrb[8].mxu1 %vm318_vm3, %v549_v22 }
 0x1d5   : > { %1073 = vmatpush3.bf16.xpose.msra.mxu1 %v675_v23  ;;  %1074 = vmatprep.mubr.msk.bf16.mxu1 %vm1370_vm1, %v1369_v6 }
 0x1d6   : > { %1084 = vmatprep.subr.bf16.mxu1 %v1369_v6 }
 0x1dc   : > { %1075 = vmatmul.mubr.msk.bf16.vlgmr.msra.gmra.mrb[12].mxu1 %vm318_vm3, %v668_v24 }
 0x1dd   : > { %1092 = vmatprep.mubr.msk.bf16.mxu1 %vm1370_vm1, %v1369_v6 }
 0x297   : > { %v359_v25 = vpop.f32.mrb[0].mxu1 }
 0x298   : > { %v1040_v26 = vpop.f32.mrb[1].mxu1  ;;  %v366_v27 = vsel %vm365_vm4, %v359_v25, -inf }
 0x299   : > { %367 = vmax.xlane.f32.xlu1 %v366_v27  ;;  %v362_v28 = vpop.f32.mrb[2].mxu1 }
 0x29a   : > { %v1041_v29 = vpop.f32.mrb[3].mxu1 }
 0x29b   : > { %v1183_v29 = vld [vmem:[#allocation8] sm:$0xff]  }
 0x29c   : > { %1085 = vmatpush3.bf16.msra.mxu1 %v1183_v29 }
 0x29d   : > { %1086 = vmatprep.subr.bf16.mxu1 %v1369_v6 }
 0x29f   : > { %v472_v30 = vpop.f32.mrb[4].mxu1 }
 0x2a0   : > { %v1052_v31 = vpop.f32.mrb[5].mxu1  ;;  %v478_v32 = vsel %vm365_vm4, %v472_v30, -inf }
 0x2a1   : > { %479 = vmax.xlane.f32.xlu0 %v478_v32  ;;  %v475_v33 = vpop.f32.mrb[6].mxu1  ;;  %v1184_v31 = vld [vmem:[#allocation8 + $0x8] sm:$0xff]  }
 0x2a2   : > { %v1053_v34 = vpop.f32.mrb[7].mxu1  ;;  %1087 = vmatpush3.bf16.msra.mxu1 %v1184_v31 }
 0x2a3   : > { %1088 = vmatprep.subr.bf16.mxu1 %v1369_v6 }
 0x2a7   : > { %v592_v35 = vpop.f32.mrb[8].mxu1 }
 0x2a8   : > { %v1064_v36 = vpop.f32.mrb[9].mxu1  ;;  %v598_v37 = vsel %vm365_vm4, %v592_v35, -inf }
 0x2a9   : > { %599 = vmax.xlane.f32.xlu0 %v598_v37  ;;  %v595_v38 = vpop.f32.mrb[10].mxu1 }
 0x2aa   : > { %v1065_v39 = vpop.f32.mrb[11].mxu1 }
 0x2af   : > { %v711_v40 = vpop.f32.mrb[12].mxu1 }
 0x2b0   : > { %v1076_v41 = vpop.f32.mrb[13].mxu1  ;;  %v717_v42 = vsel %vm365_vm4, %v711_v40, -inf }
 0x2b1   : > { %718 = vmax.xlane.f32.xlu1 %v717_v42  ;;  %v714_v43 = vpop.f32.mrb[14].mxu1  ;;  %v1185_v41 = vld [vmem:[#allocation8 + $0x10] sm:$0xff]   ;;  %v1186_v42 = vld [vmem:[#allocation8 + $0x18] sm:$0xff]  }
 0x2b2   : > { %v1077_v44 = vpop.f32.mrb[15].mxu1  ;;  %1089 = vmatpush3.bf16.msra.mxu1 %v1185_v41 }
 0x2b3   : > { %1090 = vmatprep.subr.bf16.mxu1 %v1369_v6 }
 0x2b6   : > { %1091 = vmatpush3.bf16.msra.mxu1 %v1186_v42 }
 0x326   : > { %v368_v45 = vpop.xlane.xlu1 %367 }
 0x327   : > { %v369_v46 = vsub.f32 %v359_v25, %v368_v45 }
 0x329   : > { %v370_v47 = vmul.f32 1.442695, %v369_v46 }
 0x32b   : > { %1187 = vpow2.f32 %v370_v47 }
 0x32e   : > { %v480_v48 = vpop.xlane.xlu0 %479 }
 0x32f   : > { %v481_v49 = vsub.f32 %v472_v30, %v480_v48 }
 0x331   : > { %v482_v50 = vmul.f32 1.442695, %v481_v49 }
 0x333   : > { %1189 = vpow2.f32 %v482_v50 }
 0x335   : > { %v1188_v51 = vpop.eup %1187 }
 0x336   : > { %v600_v52 = vpop.xlane.xlu0 %599  ;;  %v372_v53 = vsel %vm365_vm4, %v1188_v51, 0.0 }
 0x337   : > { %v601_v54 = vsub.f32 %v592_v35, %v600_v52  ;;  %373 = vadd.xlane.f32.xlu0 %v372_v53 }
 0x339   : > { %v602_v55 = vmul.f32 1.442695, %v601_v54 }
 0x33b   : > { %1191 = vpow2.f32 %v602_v55 }
 0x33d   : > { %v1190_v56 = vpop.eup %1189 }
 0x33e   : > { %v484_v57 = vsel %vm365_vm4, %v1190_v56, 0.0  ;;  %v719_v60 = vpop.xlane.xlu1 %718 }
 0x33f   : > { %485 = vadd.xlane.f32.xlu1 %v484_v57  ;;  %v720_v61 = vsub.f32 %v711_v40, %v719_v60 }
 0x341   : > { %v721_v62 = vmul.f32 1.442695, %v720_v61 }
 0x343   : > { %1193 = vpow2.f32 %v721_v62 }
 0x345   : > { %v1192_v58 = vpop.eup %1191 }
 0x346   : > { %v604_v59 = vsel %vm365_vm4, %v1192_v58, 0.0 }
 0x347   : > { %605 = vadd.xlane.f32.xlu0 %v604_v59 }
 0x34d   : > { %v1194_v63 = vpop.eup %1193 }
 0x34e   : > { %v723_v0 = vsel %vm365_vm4, %v1194_v63, 0.0 }
 0x350   : > { %610 = vrot.lane.b32.xlu1 %v1591_v10, %s1376_s7 }
 0x35d   : > { %491 = vrot.lane.b32.xlu0 %v1591_v10, %s1371_s21  ;;  %s872_s21 = scalar_lea.sflag [#allocation5], %s1573_s5 }
 0x374   : > { %724 = vadd.xlane.f32.xlu1 %v723_v0 }
 0x385   : > { %729 = vrot.lane.b32.xlu1 %v1591_v10, %s1377_s12 }
 0x3c4   : > { %v374_v1 = vpop.xlane.xlu0 %373 }
 0x3c5   : > { %1195 = vrcp.f32 %v374_v1 }
 0x3cc   : > { %v486_v2 = vpop.xlane.xlu1 %485 }
 0x3cd   : > { %1197 = vrcp.f32 %v486_v2 }
 0x3cf   : > { %v1196_v3 = vpop.eup %1195 }
 0x3d0   : > { %v376_v4 = vmul.f32 %v1196_v3, %v1188_v51  ;;  %v611_v10 = vpop.permute.xlu1 %610  ;;  %v1002_v51 = vld [vmem:[%s1712_s3] ss:$0 sm:$0xff] }
 0x3d1   : > { %v616_v14 = vsel %vm381_vm2, %v611_v10, 0 }
 0x3d2   : > { %v377_v5 = vpack.c.bf16 %v376_v4, %v376_v4 }
 0x3d4   : > { %v606_v7 = vpop.xlane.xlu0 %605  ;;  %1045 = vmatmul.mubr.msk.bf16.vlgmr.msra.gmra.mrb[4].mxu0 %vm365_vm4, %v377_v5 }
 0x3d5   : > { %1199 = vrcp.f32 %v606_v7  ;;  %1056 = vmatprep.mubr.msk.bf16.mxu0 %vm1370_vm1, %v1369_v6 }
 0x3d7   : > { %v1198_v8 = vpop.eup %1197 }
 0x3d8   : > { %v488_v9 = vmul.f32 %v1198_v8, %v1190_v56  ;;  %v492_v11 = vpop.permute.xlu0 %491 }
 0x3d9   : > { %v497_v12 = vsel %vm381_vm2, %v492_v11, 0 }
 0x3da   : > { %1055 = vmatpush3.bf16.msra.mxu0 %v497_v12  ;;  %v489_v13 = vpack.c.bf16 %v488_v9, %v488_v9 }
 0x3db   : > { %1066 = vmatprep.subr.bf16.mxu0 %v1369_v6 }
 0x3dd   : > { %1057 = vmatmul.mubr.msk.bf16.vlgmr.msra.gmra.mrb[8].mxu0 %vm365_vm4, %v489_v13 }
 0x3de   : > { %1067 = vmatpush3.bf16.msra.mxu0 %v616_v14  ;;  %1068 = vmatprep.mubr.msk.bf16.mxu0 %vm1370_vm1, %v1369_v6 }
 0x3df   : > { %v1200_v15 = vpop.eup %1199  ;;  %1078 = vmatprep.subr.bf16.mxu0 %v1369_v6 }
 0x3e0   : > { %v608_v16 = vmul.f32 %v1200_v15, %v1192_v58 }
 0x3e2   : > { %v609_v17 = vpack.c.bf16 %v608_v16, %v608_v16 }
 0x3e5   : > { %1069 = vmatmul.mubr.msk.bf16.vlgmr.msra.gmra.mrb[12].mxu0 %vm365_vm4, %v609_v17 }
 0x3e6   : > { %1080 = vmatprep.mubr.msk.bf16.mxu0 %vm1370_vm1, %v1369_v6 }
 0x401   : > { %v725_v18 = vpop.xlane.xlu1 %724 }
 0x402   : > { %1201 = vrcp.f32 %v725_v18 }
 0x405   : > { %v730_v19 = vpop.permute.xlu1 %729 }
 0x406   : > { %v735_v20 = vsel %vm381_vm2, %v730_v19, 0 }
 0x407   : > { %1079 = vmatpush3.bf16.msra.mxu0 %v735_v20 }
 0x40c   : > { %v1202_v21 = vpop.eup %1201 }
 0x40d   : > { %v727_v22 = vmul.f32 %v1202_v21, %v1194_v63 }
 0x40f   : > { %v728_v23 = vpack.c.bf16 %v727_v22, %v727_v22 }
 0x411   : > { %1081 = vmatmul.mubr.msk.bf16.vlgmr.msra.gmra.mrb[16].mxu0 %vm365_vm4, %v728_v23 }
 0x4a7   : > { %v419_v24 = vpop.f32.mrb[4].mxu0 }
 0x4a8   : > { %v425_v25 = vpack.c.bf16 %v419_v24, %v419_v24  ;;  %v1046_v26 = vpop.f32.mrb[5].mxu0 }
 0x4a9   : > { %v422_v27 = vpop.f32.mrb[6].mxu0 }
 0x4aa   : > { %427 = vst.msk [vmem:[#allocation2] sm:$0xf] %vm426_vm5, %v425_v25  ;;  %v1047_v28 = vpop.f32.mrb[7].mxu0 }
 0x4b0   : > { %v533_v30 = vpop.f32.mrb[8].mxu0 }
 0x4b1   : > { %v1012_v32 = vpack.c.bf16 %v533_v30, %v533_v30  ;;  %v1058_v33 = vpop.f32.mrb[9].mxu0 }
 0x4b2   : > { %v536_v34 = vpop.f32.mrb[10].mxu0 }
 0x4b3   : > { %543 = vrot.lane.b32.xlu0 %v1012_v32, %s1375_s25  ;;  %v1059_v35 = vpop.f32.mrb[11].mxu0 }
 0x4b8   : > { %v652_v36 = vpop.f32.mrb[12].mxu0 }
 0x4b9   : > { %v1013_v37 = vpack.c.bf16 %v652_v36, %v652_v36  ;;  %v1070_v38 = vpop.f32.mrb[13].mxu0 }
 0x4ba   : > { %v655_v39 = vpop.f32.mrb[14].mxu0 }
 0x4bb   : > { %662 = vrot.lane.b32.xlu1 %v1013_v37, %s1373_s30  ;;  %v1071_v40 = vpop.f32.mrb[15].mxu0  ;;  %s1293_s30 = sshll.u32 %s1378_s23, 4  ;;  %s1294_s30 = int_to_ptr.vmem [resolvable:$false] %s1293_s30 }
 0x4bc   : > { %p1296_p5 = scmp.lt.s32.totalorder %s1667_s29, %s1294_s30 }
 0x4e4   : > { %v771_v43 = vpop.f32.mrb[16].mxu0 }
 0x4e5   : > { %v1014_v44 = vpack.c.bf16 %v771_v43, %v771_v43  ;;  %v1082_v45 = vpop.f32.mrb[17].mxu0 }
 0x4e6   : > { %v774_v46 = vpop.f32.mrb[18].mxu0 }
 0x4e7   : > { %781 = vrot.lane.b32.xlu0 %v1014_v44, %s1374_s6  ;;  %v1083_v47 = vpop.f32.mrb[19].mxu0  ;;  %s1295_s6 = scalar_lea.vmem %s1294_s30, 256 }
 0x4e8   : > { %p1297_p9 = scmp.lt.s32.totalorder %s1295_s6, %s1289_s19 }
 0x4ea   : > { %p1298_p12 = por %p1297_p9, %p1296_p5 }
 0x4ec   : > { %p1299_p2 = pnand %p1298_p12, %p1292_p3 }
 0x525   : > { %v544_v48 = vpop.permute.xlu0 %543 }
 0x526   : > { %547 = vst.msk [vmem:[#allocation2] sm:$0xf] %vm546_vm6, %v544_v48 }
 0x52d   : > { %v663_v49 = vpop.permute.xlu1 %662 }
 0x52e   : > { %666 = vst.msk [vmem:[#allocation2] sm:$0xf] %vm665_vm7, %v663_v49 }
 0x559   : > { %v782_v50 = vpop.permute.xlu0 %781 }
 0x55a   : > { %785 = vst.msk [vmem:[#allocation2] sm:$0xf] %vm784_vm8, %v782_v50 }
 0x561   : > { %v786_v6 = vld [vmem:[#allocation2] sm:$0xf] }
 0x562   : > { %1093 = vmatmul.mubr.msk.bf16.vlgmr.msra.gmra.mrb[16].mxu1 %vm826_vm9, %v786_v6 }
 0x635   : > { %v864_v52 = vpop.f32.mrb[16].mxu1 }
 0x636   : > { %v865_v53 = vadd.f32 %v1002_v51, %v864_v52  ;;  %v1094_v54 = vpop.f32.mrb[17].mxu1 }
 0x637   : > { %v867_v55 = vpop.f32.mrb[18].mxu1 }
 0x638   : > { %v1095_v56 = vpop.f32.mrb[19].mxu1  ;;  %870 = vst.msk [vmem:[%s241_s27] sm:$0xff] %vm826_vm9, %v865_v53 }
 0x639   : > { %1302 = shalt.err (!%p1299_p2)
}
 0x63a   : > { %s1303_s5 = scalar_lea.hbm %s1665_s10, 128  ;;  %s1307_s12 = scalar_lea.hbm %s1713_s4, 256 }
 0x63b   : > { %p1304_p13 = scmp.ne.s32.totalorder %s1665_s10, %s1303_s5  ;;  %p1308_p4 = scmp.lt.u32.totalorder %s1665_s10, %s1713_s4 }
 0x63c   : > { %p1309_p7 = scmp.lt.u32.totalorder %s1307_s12, %s1303_s5  ;;  %p1311_p8 = scmp.lt.u32.totalorder %s1303_s5, %s1665_s10 }
 0x63d   : > { %p1305_p6 = pnand %p1304_p13, %p1727_p0 }
 0x63e   : > { %p1310_p11 = por %p1309_p7, %p1308_p4 }
 0x63f   : > { %p1306_p10 = pneg %p1305_p6 }
 0x640   : > { %p1312_p1 = por %p1311_p8, %p1310_p11 }
 0x642   : > { %p1313_p3 = pnand %p1312_p1, %p1306_p10 }
 0x644   : > { %1316 = shalt.err (!%p1313_p3)
}
 0x645   : > { %1106 = dma.vmem_to_hbm [thread:$0]  (%p1727_p0), %s1667_s29, 128, %s1665_s10, %s872_s21  }
 0x646 PF: > { %s897_s26 = sand.u32 1, %s1347_s15   ;;  %p1728_p5 = scmp.ne.s32.totalorder %s1718_s22, 0 }
 0x647   : > { %p1729_p9 = scmp.ge.s32.totalorder %s1359_s18, 2  ;;  %s898_s28 = scalar_lea.sflag [#allocation5], %s897_s26 }
 0x649   : > { %p1120_p12 = pnand %p1729_p9, %p1728_p5 }
 0x64b   : > { %1342 = dma.done.wait (!%p1120_p12), %s898_s28, 128  }
 0x64c   : > { %1344 = vsyncadd (!%p1120_p12), %s898_s28, 4294967168  ;;  %p18_p2 = scmp.ge.s32.totalorder %s1514_s11, 4   ;;  %s1730_s15 = smov %s1351_s16 }
 0x64d   : > { %s1731_s16 = smov %s1355_s17  ;;  %s1732_s17 = smov %s1523_s14 }
 0x64e   : > { %s1733_s18 = smov %s1514_s11  ;;  %20 = sbr.rel (!%p18_p2) target bundleno = 6 (0x6), region = 89 }
 0x655   :  { %903 = vsyncpa [#allocation4], 1 }
 0x656   :  { %905 = vsyncpa [#allocation4 + $0x1], 1 }
 0x657   :  { %906 = vsyncpa [#allocation7], 1 }
 0x658   :  { %907 = vsyncpa [#allocation5], 1 }
 0x659   :  { %909 = vsyncpa [#allocation5 + $0x1], 1 }

</bundles_post_ra>
